<compile_context>
chip_gen: v7x
topology: tpu7x:2x2x1
jax: 0.10.0
libtpu: 0.0.40
codegen_flags: <defaults>
</compile_context>

<pallas_src>
import functools

import jax
import jax.numpy as jnp
from jax import lax
from jax.experimental import pallas as pl
from jax.experimental.pallas import tpu as pltpu


def _round_up(x: int, m: int) -> int:
    return (x + m - 1) // m * m


def _vmem_bytes(tile: int, d_pad: int) -> int:
    """Rough per-step VMEM footprint, bytes.

    Double-buffered bf16 query/key blocks + output block + f32 (T,T) value-chain
    temporaries (dot output, exp/where results: ~3x) + (T,1) accumulator.
    """
    blocks = 2 * 2 * tile * d_pad * 2 + 2 * tile * 4
    temps = 3 * tile * tile * 4
    scratch = tile * 128 * 4  # (T,1) f32 accumulator, lane-padded
    return blocks + temps + scratch


def _pick_config(n: int, d_pad: int, block_rows=None):
    """Pick (tile, vmem_limit_bytes) with per-generation VMEM caps."""
    if block_rows is not None:  # explicit override (used by tests)
        tile = max(8, _round_up(min(int(block_rows), max(n, 8)), 8))
        return tile, int(max(32 << 20, min(2 * _vmem_bytes(tile, d_pad), 46 << 20)))

    try:
        vmem_cap = int(pltpu.get_tpu_info().vmem_capacity_bytes)
    except Exception:
        vmem_cap = 64 << 20  # conservative (v7x-class) fallback

    small_vmem = vmem_cap <= (80 << 20)          # v7x: 64 MiB / TensorCore
    tile_cap = 1024 if small_vmem else 2048      # v5e/v6e: 128 MiB VMEM
    budget = (46 << 20) if small_vmem else (96 << 20)

    if n <= 128:
        tile = _round_up(max(n, 8), 8)
    else:
        tile = min(tile_cap, _round_up(n, 128))
        while tile > 256 and _vmem_bytes(tile, d_pad) > budget:
            tile -= 256
        if small_vmem and tile > 256 and _round_up(n, tile) // tile < 2:
            # v7x has 2 TensorCores: keep >= 2 row tiles on the "parallel" axis.
            tile = max(256, _round_up(_round_up(n, 256) // 2, 128))

    vmem_limit = min(budget, max(32 << 20, 2 * _vmem_bytes(tile, d_pad)))
    return int(tile), int(vmem_limit)


def _simclr_tile_kernel(zq_ref, zk_ref, out_ref, s_ref, *,
                        inv_temperature: float, n_valid: int, pad_keys: bool):
    """One (query-tile, key-tile) step of the shifted-sum-exp NT-Xent loss.

      zq_ref : (T, Dp) bf16 pre-normalized queries -> block (qi, 0)  (resident)
      zk_ref : (T, Dp) bf16 pre-normalized keys    -> block (kj, 0)  (streamed)
      out_ref: (T, 1)  f32 per-row logsumexp, written at the last key step
      s_ref  : (T, 1)  f32 running sum of exp(sim - 1/temperature)
    """
    qi = pl.program_id(0)
    kj = pl.program_id(1)
    tile = zq_ref.shape[0]

    @pl.when(kj == 0)
    def _init():
        s_ref[...] = jnp.zeros_like(s_ref)

    # Fold 1/temperature into the (resident) query tile; bf16 MXU, f32 accum,
    # contraction on both last dims -> transpose-free (Tq, Tk) logits.
    q = zq_ref[...] * inv_temperature
    s = lax.dot_general(q, zk_ref[...],
                        dimension_numbers=(((1,), (1,)), ((), ())),
                        preferred_element_type=jnp.float32)

    # Static shift: cosine <= 1  =>  sim <= 1/temperature, so no running max.
    e = jnp.exp(s - inv_temperature)

    # Kill the diagonal (self-similarity) and zero-padded key rows directly on
    # the value via a global-index compare -- no (T,T) scratch round trips.
    qdim = qi * tile + lax.broadcasted_iota(jnp.int32, s.shape, 0)
    kdim = kj * tile + lax.broadcasted_iota(jnp.int32, s.shape, 1)
    invalid = qdim == kdim
    if pad_keys:
        invalid = invalid | (kdim >= n_valid)
    e = jnp.where(invalid, 0.0, e)

    # Accumulate the row-wise sum of exp across key tiles.
    s_ref[...] += jnp.sum(e, axis=-1, keepdims=True)

    # Finalize: per-row logsumexp_{j != i} sim[i, j].  The positive logit is
    # subtracted in the wrapper (trivially fused elementwise reduce there).
    @pl.when(kj == pl.num_programs(1) - 1)
    def _finalize():
        out_ref[...] = inv_temperature + jnp.log(s_ref[...])


def simclr_loss(z_i: jax.Array, z_j: jax.Array, temperature: float,
                *, block_rows=None) -> jax.Array:
    """z_i, z_j: (batch, dim).  Returns scalar float32 NT-Xent loss."""
    assert z_i.shape == z_j.shape and z_i.ndim == 2
    b, d = z_i.shape
    n = 2 * b
    inv_t = float(1.0 / temperature)

    # L2-normalize ONCE in f32 (PyTorch clamps ||x||*||y|| at 1e-8; we clamp
    # each squared norm at 1e-16 -- identical for non-degenerate embeddings).
    z = jnp.concatenate([z_i, z_j], axis=0).astype(jnp.float32)
    z_hat = z * lax.rsqrt(jnp.maximum(jnp.sum(z * z, axis=-1, keepdims=True),
                                      1e-16))

    # Positive logit pos_a = cos(z[a], z[(a+B) mod N]) / temperature -- plain
    # jnp; XLA fuses this mem-bound N x D reduce for free.
    pos = jnp.sum(z_hat * jnp.roll(z_hat, -b, axis=0), axis=-1) * inv_t  # (n,)

    d_pad = _round_up(d, 128)
    tile, vmem_limit = _pick_config(n, d_pad, block_rows)
    n_pad = _round_up(n, tile)

    zn = z_hat
    if n_pad != n or d_pad != d:
        zn = jnp.pad(zn, ((0, n_pad - n), (0, d_pad - d)))
    zn = zn.astype(jnp.bfloat16)   # single bf16 stream for queries AND keys

    grid = (n_pad // tile, n_pad // tile)
    row_spec = pl.BlockSpec((tile, d_pad), lambda qi, kj: (qi, 0))
    col_spec = pl.BlockSpec((tile, d_pad), lambda qi, kj: (kj, 0))
    out_spec = pl.BlockSpec((tile, 1), lambda qi, kj: (qi, 0))

    kernel = functools.partial(_simclr_tile_kernel,
                               inv_temperature=inv_t,
                               n_valid=int(n),
                               pad_keys=bool(n_pad != n))

    lse = pl.pallas_call(
        kernel,
        out_shape=jax.ShapeDtypeStruct((n_pad, 1), jnp.float32),
        grid_spec=pltpu.PrefetchScalarGridSpec(
            num_scalar_prefetch=0,
            grid=grid,
            in_specs=[row_spec, col_spec],
            out_specs=out_spec,
            scratch_shapes=[pltpu.VMEM((tile, 1), jnp.float32)]),
        compiler_params=pltpu.CompilerParams(
            dimension_semantics=("parallel", "arbitrary"),
            vmem_limit_bytes=vmem_limit),
    )(zn, zn)

    # Padded query rows are sliced away here; mean over the N real rows.
    return jnp.sum(lse[:n, 0] - pos) / n


def _simclr_loss_ref(z_i, z_j, temperature):
    """Pure-JAX reference mirroring the PyTorch forward (for sanity check)."""
    z = jnp.concatenate([z_i, z_j], axis=0).astype(jnp.float32)
    n = z.shape[0]
    b = n // 2
    norms = jnp.linalg.norm(z, axis=-1, keepdims=True)
    denom = jnp.maximum(norms * norms.T, 1e-8)
    sim = (z @ z.T) / denom / temperature
    idx = jnp.arange(n)
    pos_col = jnp.where(idx < b, idx + b, idx - b)
    pos = sim[idx, pos_col]
    masked = jnp.where(jnp.eye(n, dtype=bool), -jnp.inf, sim)
    lse = jax.scipy.special.logsumexp(masked, axis=-1)
    return jnp.sum(lse - pos) / n


if __name__ == "__main__":
    key = jax.random.PRNGKey(0)
    k1, k2 = jax.random.split(key)

    # Small shapes consistent with the module: (batch, dim) embedding pairs.
    batch, dim = 4, 32
    temperature = 0.5
    z_i = jax.random.normal(k1, (batch, dim), dtype=jnp.float32)
    z_j = jax.random.normal(k2, (batch, dim), dtype=jnp.float32)

    loss = simclr_loss(z_i, z_j, temperature)
    jax.block_until_ready(loss)
    ref = _simclr_loss_ref(z_i, z_j, temperature)
    assert jnp.allclose(loss, ref, atol=5e-2, rtol=5e-2), (loss, ref)

    # Exercise the tiled path: multi-tile grid, diagonal tiles, padded keys,
    # padded query rows.
    k3, k4 = jax.random.split(k2)
    z_i2 = jax.random.normal(k3, (20, 96), dtype=jnp.float32)
    z_j2 = jax.random.normal(k4, (20, 96), dtype=jnp.float32)
    loss2 = simclr_loss(z_i2, z_j2, temperature, block_rows=16)
    jax.block_until_ready(loss2)
    ref2 = _simclr_loss_ref(z_i2, z_j2, temperature)
    assert jnp.allclose(loss2, ref2, atol=5e-2, rtol=5e-2), (loss2, ref2)

    print("KERNEL_OK")
</pallas_src>

<mosaic_0001>
module attributes {stable_mosaic.version = 11 : i64} {
  func.func @_simclr_tile_kernel(%arg0: i32, %arg1: i32, %arg2: memref<8x128xbf16, #tpu.memory_space<vmem>>, %arg3: memref<8x128xbf16, #tpu.memory_space<vmem>>, %arg4: memref<8x1xf32, #tpu.memory_space<vmem>>, %arg5: memref<8x1xf32, #tpu.memory_space<vmem>>) attributes {dimension_semantics = [#tpu.dimension_semantics<parallel>, #tpu.dimension_semantics<arbitrary>], iteration_bounds = array<i64: 1, 1>, scalar_prefetch = 0 : i64, scratch_operands = 1 : i64, tpu.core_type = #tpu.core_type<tc>, window_params = [{transform_indices = @transform_0, window_bounds = array<i64: 8, 128>}, {transform_indices = @transform_1, window_bounds = array<i64: 8, 128>}, {transform_indices = @transform_2, window_bounds = array<i64: 8, 1>}]} {
    %c0_i32 = arith.constant 0 : i32
    %0 = arith.cmpi eq, %arg1, %c0_i32 : i32
    %1 = arith.extui %0 : i1 to i32
    %c0_i32_0 = arith.constant 0 : i32
    %2 = arith.cmpi ne, %1, %c0_i32_0 : i32
    scf.if %2 {
      %cst_15 = arith.constant 0.000000e+00 : f32
      %30 = vector.broadcast %cst_15 : f32 to vector<8x1xf32>
      %c0_16 = arith.constant 0 : index
      %c0_17 = arith.constant 0 : index
      %31 = vector.load %arg5[%c0_16, %c0_17] : memref<8x1xf32, #tpu.memory_space<vmem>>, vector<8x1xf32>
      tpu.vector_store %arg5[%c0_16, %c0_17], %30 {strides = array<i32>} : memref<8x1xf32, #tpu.memory_space<vmem>>, vector<8x1xf32>,
    } else {
    }
    %c0 = arith.constant 0 : index
    %c0_1 = arith.constant 0 : index
    %3 = vector.load %arg2[%c0, %c0_1] : memref<8x128xbf16, #tpu.memory_space<vmem>>, vector<8x128xbf16>
    %cst = arith.constant 2.000000e+00 : bf16
    %4 = vector.broadcast %cst : bf16 to vector<8x128xbf16>
    %5 = arith.mulf %3, %4 : vector<8x128xbf16>
    %c0_2 = arith.constant 0 : index
    %c0_3 = arith.constant 0 : index
    %6 = vector.load %arg3[%c0_2, %c0_3] : memref<8x128xbf16, #tpu.memory_space<vmem>>, vector<8x128xbf16>
    %cst_4 = arith.constant dense<0.000000e+00> : vector<8x8xf32>
    %7 = tpu.matmul %5, %6, %cst_4 {dimension_numbers = #tpu.dot_dimension_numbers<[1], [1], [0], [0], [0, 0, 1, 0], [], []>} : vector<8x128xbf16>, vector<8x128xbf16>, vector<8x8xf32> -> vector<8x8xf32>
    %cst_5 = arith.constant 2.000000e+00 : f32
    %8 = vector.broadcast %cst_5 : f32 to vector<8x8xf32>
    %9 = arith.subf %7, %8 : vector<8x8xf32>
    %10 = math.exp %9 : vector<8x8xf32>
    %c8_i32 = arith.constant 8 : i32
    %11 = arith.muli %arg0, %c8_i32 : i32
    %12 = tpu.iota {dimensions = array<i32: 0>} : vector<8x8xi32>
    %13 = vector.broadcast %11 : i32 to vector<8x8xi32>
    %14 = arith.addi %13, %12 : vector<8x8xi32>
    %c8_i32_6 = arith.constant 8 : i32
    %15 = arith.muli %arg1, %c8_i32_6 : i32
    %16 = tpu.iota {dimensions = array<i32: 1>} : vector<8x8xi32>
    %17 = vector.broadcast %15 : i32 to vector<8x8xi32>
    %18 = arith.addi %17, %16 : vector<8x8xi32>
    %19 = arith.cmpi eq, %14, %18 : vector<8x8xi32>
    %cst_7 = arith.constant 0.000000e+00 : f32
    %20 = vector.broadcast %cst_7 : f32 to vector<8x8xf32>
    %21 = arith.select %19, %20, %10 : vector<8x8xi1>, vector<8x8xf32>
    %c0_8 = arith.constant 0 : index
    %c0_9 = arith.constant 0 : index
    %22 = vector.load %arg5[%c0_8, %c0_9] : memref<8x1xf32, #tpu.memory_space<vmem>>, vector<8x1xf32>
    %cst_10 = arith.constant dense<0.000000e+00> : vector<8xf32>
    %23 = vector.multi_reduction <add>, %21, %cst_10 [1] : vector<8x8xf32> to vector<8xf32>
    %24 = vector.shape_cast %23 : vector<8xf32> to vector<8x1xf32>
    %25 = arith.addf %22, %24 : vector<8x1xf32>
    %c0_11 = arith.constant 0 : index
    %c0_12 = arith.constant 0 : index
    %26 = vector.load %arg5[%c0_11, %c0_12] : memref<8x1xf32, #tpu.memory_space<vmem>>, vector<8x1xf32>
    tpu.vector_store %arg5[%c0_11, %c0_12], %25 {strides = array<i32>} : memref<8x1xf32, #tpu.memory_space<vmem>>, vector<8x1xf32>,
    %c0_i32_13 = arith.constant 0 : i32
    %27 = arith.cmpi eq, %arg1, %c0_i32_13 : i32
    %28 = arith.extui %27 : i1 to i32
    %c0_i32_14 = arith.constant 0 : i32
    %29 = arith.cmpi ne, %28, %c0_i32_14 : i32
    scf.if %29 {
      %c0_15 = arith.constant 0 : index
      %c0_16 = arith.constant 0 : index
      %30 = vector.load %arg5[%c0_15, %c0_16] : memref<8x1xf32, #tpu.memory_space<vmem>>, vector<8x1xf32>
      %31 = math.log %30 : vector<8x1xf32>
      %cst_17 = arith.constant 2.000000e+00 : f32
      %32 = vector.broadcast %cst_17 : f32 to vector<8x1xf32>
      %33 = arith.addf %32, %31 : vector<8x1xf32>
      %c0_18 = arith.constant 0 : index
      %c0_19 = arith.constant 0 : index
      %34 = vector.load %arg4[%c0_18, %c0_19] : memref<8x1xf32, #tpu.memory_space<vmem>>, vector<8x1xf32>
      tpu.vector_store %arg4[%c0_18, %c0_19], %33 {strides = array<i32>} : memref<8x1xf32, #tpu.memory_space<vmem>>, vector<8x1xf32>,
    } else {
    }
    return
  }
  func.func @transform_0(%arg0: i32, %arg1: i32) -> (i32, i32) {
    %c0_i32 = arith.constant 0 : i32
    %c0_i32_0 = arith.constant 0 : i32
    return %arg0, %c0_i32 : i32, i32
  }
  func.func @transform_1(%arg0: i32, %arg1: i32) -> (i32, i32) {
    %c0_i32 = arith.constant 0 : i32
    %c0_i32_0 = arith.constant 0 : i32
    return %arg1, %c0_i32 : i32, i32
  }
  func.func @transform_2(%arg0: i32, %arg1: i32) -> (i32, i32) {
    %c0_i32 = arith.constant 0 : i32
    %c0_i32_0 = arith.constant 0 : i32
    return %arg0, %c0_i32 : i32, i32
  }
}

</mosaic_0001>

<bundles_post_ra>
// kernel: tpu_custom_call.1
= control target key start
LH: loop header
LB: loop body
LE: loop exit
PB: predicated region body
PF: predicated region fallthrough
CT: control target
= control target key end

     0   :  { %7 = vsyncpa [#allocation4], 0  ;;  %s237_s0 = inlined_call_operand.hbm [shape: bf16[8,128], index: 0, kind: input, shape index: {}]   ;;  %s238_s1 = inlined_call_operand.hbm [shape: bf16[8,128], index: 1, kind: input, shape index: {}]   ;;  %s239_s2 = inlined_call_operand.vmem [shape: f32[8,1], index: 2, kind: output, shape index: {}]  }
   0x1   :  { %8 = vsyncpa [#allocation6], 0  ;;  %s188_s9 = smov [#allocation3]   ;;  %s189_s11 = smov [#allocation5]  }
   0x2   :  { %s15_s10 = sshll.u32 %s188_s9, 4  ;;  %s25_s12 = sshll.u32 %s189_s11, 4  ;;  %s16_s10 = int_to_ptr.vmem [resolvable:$true] %s15_s10  ;;  %s26_s12 = int_to_ptr.vmem [resolvable:$true] %s25_s12 }
   0x3   :  { %s140_s15 = scalar_lea.hbm %s237_s0, 64 }
   0x4   :  { %p141_p0 = scmp.ne.s32.totalorder %s237_s0, %s140_s15  ;;  %p144_p1 = scmp.lt.u32.totalorder %s140_s15, %s237_s0 }
   0x6   :  { %p146_p2 = pnand %p144_p1, %p141_p0 }
   0x8   :  { %149 = shalt.err (!%p146_p2)
}
   0x9   :  { %s150_s20 = scalar_lea.vmem %s16_s10, 64  ;;  %p155_p4 = scmp.lt.s32.totalorder %s16_s10, %s16_s10 }
   0xa   :  { %p151_p3 = scmp.ne.s32.totalorder %s16_s10, %s150_s20  ;;  %p156_p5 = scmp.lt.s32.totalorder %s150_s20, %s150_s20 }
   0xc   :  { %p157_p6 = por %p156_p5, %p155_p4 }
   0xe   :  { %p158_p7 = pnand %p157_p6, %p151_p3 }
  0x10   :  { %161 = shalt.err (!%p158_p7)
}
  0x11   :  { %18 = dma.hbm_to_vmem [thread:$0]  %s237_s0, 64, %s16_s10, [#allocation4]  }
  0x12   :  { %s162_s25 = scalar_lea.hbm %s238_s1, 64 }
  0x13   :  { %p163_p8 = scmp.ne.s32.totalorder %s238_s1, %s162_s25  ;;  %p166_p9 = scmp.lt.u32.totalorder %s162_s25, %s238_s1 }
  0x15   :  { %p168_p10 = pnand %p166_p9, %p163_p8 }
  0x17   :  { %171 = shalt.err (!%p168_p10)
}
  0x18   :  { %s172_s30 = scalar_lea.vmem %s26_s12, 64  ;;  %p177_p12 = scmp.lt.s32.totalorder %s26_s12, %s26_s12 }
  0x19   :  { %p173_p11 = scmp.ne.s32.totalorder %s26_s12, %s172_s30  ;;  %p178_p13 = scmp.lt.s32.totalorder %s172_s30, %s172_s30 }
  0x1b   :  { %p179_p0 = por %p178_p13, %p177_p12 }
  0x1d   :  { %p180_p1 = pnand %p179_p0, %p173_p11 }
  0x1f   :  { %183 = shalt.err (!%p180_p1)
}
  0x20   :  { %28 = dma.hbm_to_vmem [thread:$0]  %s238_s1, 64, %s26_s12, [#allocation6]  }
  0x21   :  { %184 = dma.done.wait [#allocation4], 64  }
  0x22   :  { %185 = vsyncadd [#allocation4], 4294967232 }
  0x23   :  { %186 = dma.done.wait [#allocation6], 64  }
  0x24   :  { %187 = vsyncadd [#allocation6], 4294967232  ;;  %vm41_vm0 = vcmask 7168   ;;  %v190_v0 = vmov 0.0   ;;  %vm191_vm1 = vmmov 0   ;;  %v90_v10 = vlaneseq }
  0x25   :  { %42 = vst.msk [vmem:[#allocation2] sm:$0xff] %vm41_vm0, %v190_v0  ;;  %126 = vmatprep.subr.bf16.mxu0 %v190_v0  ;;  %128 = vmatprep.mubr.msk.bf16.mxu0 %vm191_vm1, %v190_v0  ;;  %v45_v1 = vld [vmem:[#allocation5] sm:$0xf]  ;;  %v43_v2 = vld [vmem:[#allocation3] sm:$0xf]  ;;  %vm102_vm3 = vcmask 64512  }
  0x26   :  { %127 = vmatpush3.bf16.xpose.msra.mxu0 %v45_v1  ;;  %v44_v3 = vmul.bf16 1073758208, %v43_v2  ;;  %v91_v11 = vshrl.u32 %v90_v10, 7  ;;  %v96_v12 = vand.u32 127, %v90_v10 }
  0x28   :  { %vm99_vm2 = vcmp.eq.s32.totalorder %v91_v11, %v96_v12 }
  0x2c   :  { %v101_v16 = vld [vmem:[#allocation2] sm:$0xff] }
  0x2d   :  { %129 = vmatmul.mubr.bf16.vlgmr.msra.gmra.mrb[0].mxu0 %v44_v3 }
 0x100   :  { %v80_v4 = vpop.f32.mrb[0].mxu0 }
 0x101   :  { %v123_v5 = vadd.f32 -2.0, %v80_v4  ;;  %v130_v6 = vpop.f32.mrb[1].mxu0 }
 0x102   :  { %v83_v7 = vpop.f32.mrb[2].mxu0 }
 0x103   :  { %v87_v8 = vmul.f32 1.442695, %v123_v5  ;;  %v131_v9 = vpop.f32.mrb[3].mxu0 }
 0x105   :  { %136 = vpow2.f32 %v87_v8 }
 0x10f   :  { %v137_v13 = vpop.eup %136 }
 0x110   :  { %v100_v14 = vsel %vm99_vm2, 0.0, %v137_v13 }
 0x111   :  { %v103_v15 = vsel %vm102_vm3, %v100_v14, 0.0 }
 0x112   :  { %104 = vadd.xlane.f32.xlu0 %v103_v15 }
 0x19f   :  { %v105_v17 = vpop.xlane.xlu0 %104 }
 0x1a0   :  { %v106_v18 = vadd.f32 %v105_v17, %v101_v16 }
 0x1a2   :  { %108 = vst.msk [vmem:[#allocation2] sm:$0xff] %vm41_vm0, %v106_v18 }
 0x1a9   :  { %v112_v19 = vld [vmem:[#allocation2] sm:$0xff] }
 0x1aa   :  { %138 = vlog2.f32 %v112_v19 }
 0x1b4   :  { %v139_v20 = vpop.eup %138 }
 0x1b5   :  { %v114_v21 = vmul.f32 0.6931472, %v139_v20 }
 0x1b7   :  { %v115_v22 = vadd.f32 2.0, %v114_v21 }
 0x1b9   :  { %116 = vst.msk [vmem:[%s239_s2] sm:$0xff] %vm41_vm0, %v115_v22 }
 0x1ba   :  { %121 = vsyncpa [#allocation4], 1 }
 0x1bb   :  { %122 = vsyncpa [#allocation6], 1 }

</bundles_post_ra>
